<compile_context>
chip_gen: v7x
topology: tpu7x:2x2x1
jax: 0.10.0
libtpu: 0.0.40
codegen_flags: <defaults>
</compile_context>

<pallas_src>
import math
import functools

import jax
import jax.numpy as jnp
from jax.experimental import pallas as pl
from jax.experimental.pallas import tpu as pltpu


# ----------------------------------------------------------------------------
# Stage 1: fused LayerNorm + linear_1 / linear_2 + mask (per row).
# ----------------------------------------------------------------------------
def _project_kernel(m_ref, mask_ref, gamma_ref, beta_ref,
                    w1t_ref, b1_ref, w2t_ref, b2_ref,
                    a_ref, b_ref, *, ln_eps):
    x = m_ref[...].astype(jnp.float32)                       # (TR, C_m)
    mu = jnp.mean(x, axis=-1, keepdims=True)
    var = jnp.mean(jnp.square(x - mu), axis=-1, keepdims=True)
    ln = (x - mu) * jax.lax.rsqrt(var + ln_eps) * gamma_ref[...] + beta_ref[...]
    ln_lo = ln.astype(w1t_ref.dtype)                         # bf16 MXU operand
    msk = mask_ref[...]                                      # (TR, 1) f32

    a = jnp.dot(ln_lo, w1t_ref[...], preferred_element_type=jnp.float32)
    a = (a + b1_ref[...]) * msk
    b = jnp.dot(ln_lo, w2t_ref[...], preferred_element_type=jnp.float32)
    b = (b + b2_ref[...]) * msk

    a_ref[...] = a.astype(a_ref.dtype)                       # bf16
    b_ref[...] = b.astype(b_ref.dtype)                       # f32


# ----------------------------------------------------------------------------
# Stage 2: per-(i, j) pair tile: outer product + linear_out + mask-normalize.
# ----------------------------------------------------------------------------
def _pair_kernel(a_ref, bt_ref, mask_i_ref, mask_j_ref, wot_ref, bo_ref,
                 out_ref, *, eps, lane_dense):
    nb, ti, ch = a_ref.shape
    tj = bt_ref.shape[2]
    cz = wot_ref.shape[1]

    wot = wot_ref[...]                                       # (C_h, C_z) f32
    bo = bo_ref[...]                                         # (1, C_z)  f32
    wot_lo = None if lane_dense else wot.astype(a_ref.dtype)

    for n in range(nb):                                      # static, nb is small
        a = a_ref[n]                                         # (TI, C_h) bf16
        bt = bt_ref[n]                                       # (C_h, TJ) f32
        if lane_dense:
            # Bz[h, j, z] = b[j, h] * Wo^T[h, z]; built in f32, rounded to bf16
            # once, minor dim C_z stays lane-dense (128 lanes active).
            bz = (bt[:, :, None] * wot[:, None, :]).astype(a.dtype)   # (C_h,TJ,C_z)
            out = jnp.dot(a, bz.reshape(ch, tj * cz),
                          preferred_element_type=jnp.float32)          # (TI, TJ*C_z)
            out = out.reshape(ti, tj, cz)
        else:
            # Fallback when C_z is not a multiple of the 128-lane width.
            b = bt.T                                                    # (TJ, C_h)
            outer = a.astype(jnp.float32)[:, None, :] * b[None, :, :]  # (TI,TJ,C_h)
            out = jnp.dot(outer.reshape(ti * tj, ch).astype(a.dtype), wot_lo,
                          preferred_element_type=jnp.float32).reshape(ti, tj, cz)

        out = out + bo
        # norm = mask_i * mask_j + eps on the small (TI, TJ) tile only; one
        # reciprocal (EUP) + broadcast multiply instead of TI*TJ*C_z divides.
        norm = mask_i_ref[n] * mask_j_ref[n] + eps                      # (TI, TJ)
        inv = pl.reciprocal(norm, approx=False)
        out_ref[n] = (out * inv[:, :, None]).astype(out_ref.dtype)


# ----------------------------------------------------------------------------
# Wrapper
# ----------------------------------------------------------------------------
def _largest_divisor(n, candidates):
    for c in candidates:
        if c <= n and n % c == 0:
            return c
    return n


def _pick_nb(N, ti, tj, c_z, out_itemsize, target_bytes=4 * 1024 * 1024):
    per_batch = max(ti * tj * c_z * out_itemsize, 1)
    cap = min(N, max(1, target_bytes // per_batch))
    for nb in range(cap, 0, -1):
        if N % nb == 0:
            return nb
    return 1


def outer_product_update_pallas(m, mask, params, *, eps=1e-3, ln_eps=1e-5,
                                matmul_dtype=jnp.bfloat16,
                                out_dtype=jnp.bfloat16,
                                tile_i=None, tile_j=None):
    """Fused OuterProductUpdate forward.

    m: [..., R, C_m]; mask: [..., R] or None.
    params = (gamma, beta, W1, b1, W2, b2, Wo, bo), PyTorch Linear layout
    (W*: [out_dim, in_dim]).  Returns [..., R, R, C_z] in `out_dtype`
    (bf16 by default -- the kernel is output-writeback bound; pass
    out_dtype=m.dtype / None to mirror the torch module's dtype exactly).
    """
    gamma, beta, W1, b1, W2, b2, Wo, bo = params
    *lead, R, c_m = m.shape
    N = int(math.prod(lead)) if lead else 1
    c_h = W1.shape[0]
    c_z = Wo.shape[0]
    out_dtype = jnp.dtype(m.dtype if out_dtype is None else out_dtype)

    if mask is None:
        mask = jnp.ones((*lead, R), jnp.float32)

    # ---- static tiling decisions -------------------------------------------
    ti = tile_i or _largest_divisor(R, (128, 64, 32, 16, 8))
    tj = tile_j or (128 if R % 128 == 0 else R)
    if R % ti != 0 or not (ti % 8 == 0 or ti == R):
        raise ValueError(f"tile_i={ti} must divide R={R} and be a multiple of 8 (or == R)")
    if R % tj != 0 or not (tj % 128 == 0 or tj == R):
        raise ValueError(f"tile_j={tj} must divide R={R} and be a multiple of 128 (or == R)")
    nb = _pick_nb(N, ti, tj, c_z, out_dtype.itemsize)
    lane_dense = (c_z % 128 == 0)

    # ---- parameters: pre-transpose / pre-cast ONCE in the wrapper ----------
    W1T = jnp.asarray(W1).T.astype(matmul_dtype)             # (C_m, C_h)
    W2T = jnp.asarray(W2).T.astype(matmul_dtype)
    WoT = jnp.asarray(Wo, jnp.float32).T                     # (C_h, C_z), f32
    b1r = jnp.asarray(b1, jnp.float32).reshape(1, c_h)
    b2r = jnp.asarray(b2, jnp.float32).reshape(1, c_h)
    bor = jnp.asarray(bo, jnp.float32).reshape(1, c_z)
    gammar = jnp.asarray(gamma, jnp.float32).reshape(1, c_m)
    betar = jnp.asarray(beta, jnp.float32).reshape(1, c_m)

    # ---- Stage 1: LN + linear_1/linear_2 + mask over flattened rows --------
    NR = N * R
    m2 = m.reshape(NR, c_m)
    mask2 = mask.reshape(NR, 1).astype(jnp.float32)
    tr = _largest_divisor(NR, (512, 256, 128, 64, 32, 16, 8))

    a_flat, b_flat = pl.pallas_call(
        functools.partial(_project_kernel, ln_eps=float(ln_eps)),
        out_shape=(jax.ShapeDtypeStruct((NR, c_h), matmul_dtype),
                   jax.ShapeDtypeStruct((NR, c_h), jnp.float32)),
        grid_spec=pltpu.PrefetchScalarGridSpec(
            num_scalar_prefetch=0,
            grid=(NR // tr,),
            in_specs=[
                pl.BlockSpec((tr, c_m), lambda r: (r, 0)),    # m rows
                pl.BlockSpec((tr, 1), lambda r: (r, 0)),      # mask rows
                pl.BlockSpec((1, c_m), lambda r: (0, 0)),     # LN gamma
                pl.BlockSpec((1, c_m), lambda r: (0, 0)),     # LN beta
                pl.BlockSpec((c_m, c_h), lambda r: (0, 0)),   # W1^T
                pl.BlockSpec((1, c_h), lambda r: (0, 0)),     # b1
                pl.BlockSpec((c_m, c_h), lambda r: (0, 0)),   # W2^T
                pl.BlockSpec((1, c_h), lambda r: (0, 0)),     # b2
            ],
            out_specs=(pl.BlockSpec((tr, c_h), lambda r: (r, 0)),
                       pl.BlockSpec((tr, c_h), lambda r: (r, 0))),
        ),
        compiler_params=pltpu.CompilerParams(
            dimension_semantics=("parallel",)),
    )(m2, mask2, gammar, betar, W1T, b1r, W2T, b2r)

    a = a_flat.reshape(N, R, c_h)                            # bf16
    bT = jnp.swapaxes(b_flat.reshape(N, R, c_h), 1, 2)       # (N, C_h, R) f32 (tiny)
    mask_col = mask.reshape(N, R, 1).astype(jnp.float32)
    mask_row = mask.reshape(N, 1, R).astype(jnp.float32)

    # ---- Stage 2: pair tile kernel ------------------------------------------
    grid = (N // nb, R // ti, R // tj)
    out = pl.pallas_call(
        functools.partial(_pair_kernel, eps=float(eps), lane_dense=lane_dense),
        out_shape=jax.ShapeDtypeStruct((N, R, R, c_z), out_dtype),
        grid_spec=pltpu.PrefetchScalarGridSpec(
            num_scalar_prefetch=0,
            grid=grid,
            in_specs=[
                pl.BlockSpec((nb, ti, c_h), lambda n, i, j: (n, i, 0)),   # a rows (i)
                pl.BlockSpec((nb, c_h, tj), lambda n, i, j: (n, 0, j)),   # b^T cols (j)
                pl.BlockSpec((nb, ti, 1), lambda n, i, j: (n, i, 0)),     # mask_i
                pl.BlockSpec((nb, 1, tj), lambda n, i, j: (n, 0, j)),     # mask_j
                pl.BlockSpec((c_h, c_z), lambda n, i, j: (0, 0)),         # Wo^T (f32)
                pl.BlockSpec((1, c_z), lambda n, i, j: (0, 0)),           # bo
            ],
            out_specs=pl.BlockSpec((nb, ti, tj, c_z),
                                   lambda n, i, j: (n, i, j, 0)),
        ),
        compiler_params=pltpu.CompilerParams(
            # Every output block is written exactly once -> all axes parallel
            # (lets the grid shard over both v7x TensorCores even for small N).
            dimension_semantics=("parallel", "parallel", "parallel"),
            # 48 MiB leaves headroom on v7x (64 MiB/TC); ample on v5e/v6e.
            vmem_limit_bytes=48 * 1024 * 1024,
        ),
    )(a, bT, mask_col, mask_row, WoT, bor)

    return out.reshape(*lead, R, R, c_z)


# ----------------------------------------------------------------------------
# Pure-JAX reference (restates the PyTorch forward; bf16 matmul operands).
# ----------------------------------------------------------------------------
def outer_product_update_ref(m, mask, params, *, eps=1e-3, ln_eps=1e-5,
                             matmul_dtype=jnp.bfloat16):
    gamma, beta, W1, b1, W2, b2, Wo, bo = params
    if mask is None:
        mask = jnp.ones(m.shape[:-1], jnp.float32)
    cd = matmul_dtype

    mf = m.astype(jnp.float32)
    mu = jnp.mean(mf, axis=-1, keepdims=True)
    var = jnp.mean(jnp.square(mf - mu), axis=-1, keepdims=True)
    ln = (mf - mu) * jax.lax.rsqrt(var + ln_eps) * gamma + beta

    a = jnp.einsum('...rc,hc->...rh', ln.astype(cd), W1.astype(cd),
                   preferred_element_type=jnp.float32) + b1
    b = jnp.einsum('...rc,hc->...rh', ln.astype(cd), W2.astype(cd),
                   preferred_element_type=jnp.float32) + b2
    maske = mask[..., None].astype(jnp.float32)
    a = a * maske
    b = b * maske

    outer = jnp.einsum('...abc,...adc->...abdc', a, b)                   # f32
    out = jnp.einsum('...h,zh->...z', outer.astype(cd), Wo.astype(cd),
                     preferred_element_type=jnp.float32) + bo
    norm = jnp.einsum('...abc,...adc->...abdc', maske, maske) + eps
    return out / norm                                                     # f32


if __name__ == "__main__":
    # Small shapes consistent with the module's forward contract.
    B, S, R = 2, 2, 16                # batch, N_seq, N_res
    c_m, c_hidden, c_z = 64, 32, 128  # c_z multiple of 128 -> lane-dense path

    key = jax.random.PRNGKey(0)
    ks = jax.random.split(key, 10)

    m = jax.random.normal(ks[0], (B, S, R, c_m), jnp.float32)
    mask = (jax.random.uniform(ks[1], (B, S, R)) > 0.2).astype(jnp.float32)

    # Deterministic synthetic parameters (PyTorch Linear layout [out, in]).
    # linear_out uses init='final' (zeros) in the module; use small random
    # values here so the correctness check is non-trivial.
    gamma = 1.0 + 0.1 * jax.random.normal(ks[2], (c_m,), jnp.float32)
    beta = 0.1 * jax.random.normal(ks[3], (c_m,), jnp.float32)
    W1 = jax.random.normal(ks[4], (c_hidden, c_m), jnp.float32) / math.sqrt(c_m)
    b1 = 0.1 * jax.random.normal(ks[5], (c_hidden,), jnp.float32)
    W2 = jax.random.normal(ks[6], (c_hidden, c_m), jnp.float32) / math.sqrt(c_m)
    b2 = 0.1 * jax.random.normal(ks[7], (c_hidden,), jnp.float32)
    Wo = jax.random.normal(ks[8], (c_z, c_hidden), jnp.float32) / math.sqrt(c_hidden)
    bo = 0.1 * jax.random.normal(ks[9], (c_z,), jnp.float32)
    params = (gamma, beta, W1, b1, W2, b2, Wo, bo)

    out = outer_product_update_pallas(m, mask, params)
    out = jax.block_until_ready(out)

    ref = outer_product_update_ref(m, mask, params)
    ref = jax.block_until_ready(ref)

    assert out.shape == (B, S, R, R, c_z), out.shape
    out_f32 = out.astype(jnp.float32)
    max_err = float(jnp.max(jnp.abs(out_f32 - ref)))
    # Both paths use bf16 matmul operands with f32 accumulation; the kernel
    # additionally groups the bf16 rounding as (b*Wo) instead of (a*b) and
    # emits a bf16 output, so tolerances are set at the bf16 level.
    # NOTE: fully-masked pairs produce bo/eps (amplified ~1000x); downstream
    # consumers are expected to mask those positions.
    assert jnp.allclose(out_f32, ref, atol=5e-2, rtol=5e-2), max_err

    print("KERNEL_OK")
</pallas_src>

<mosaic_0001>
module attributes {stable_mosaic.version = 11 : i64} {
  func.func @_project_kernel(%arg0: i32, %arg1: memref<64x64xf32, #tpu.memory_space<vmem>>, %arg2: memref<64x1xf32, #tpu.memory_space<vmem>>, %arg3: memref<1x64xf32, #tpu.memory_space<vmem>>, %arg4: memref<1x64xf32, #tpu.memory_space<vmem>>, %arg5: memref<64x32xbf16, #tpu.memory_space<vmem>>, %arg6: memref<1x32xf32, #tpu.memory_space<vmem>>, %arg7: memref<64x32xbf16, #tpu.memory_space<vmem>>, %arg8: memref<1x32xf32, #tpu.memory_space<vmem>>, %arg9: memref<64x32xbf16, #tpu.memory_space<vmem>>, %arg10: memref<64x32xf32, #tpu.memory_space<vmem>>) attributes {dimension_semantics = [#tpu.dimension_semantics<parallel>], iteration_bounds = array<i64: 1>, scalar_prefetch = 0 : i64, scratch_operands = 0 : i64, tpu.core_type = #tpu.core_type<tc>, window_params = [{transform_indices = @transform_0, window_bounds = array<i64: 64, 64>}, {transform_indices = @transform_1, window_bounds = array<i64: 64, 1>}, {pipeline_mode = #tpu.pipeline_mode<synchronous>, transform_indices = @transform_2, window_bounds = array<i64: 1, 64>}, {pipeline_mode = #tpu.pipeline_mode<synchronous>, transform_indices = @transform_3, window_bounds = array<i64: 1, 64>}, {pipeline_mode = #tpu.pipeline_mode<synchronous>, transform_indices = @transform_4, window_bounds = array<i64: 64, 32>}, {pipeline_mode = #tpu.pipeline_mode<synchronous>, transform_indices = @transform_5, window_bounds = array<i64: 1, 32>}, {pipeline_mode = #tpu.pipeline_mode<synchronous>, transform_indices = @transform_6, window_bounds = array<i64: 64, 32>}, {pipeline_mode = #tpu.pipeline_mode<synchronous>, transform_indices = @transform_7, window_bounds = array<i64: 1, 32>}, {transform_indices = @transform_8, window_bounds = array<i64: 64, 32>}, {transform_indices = @transform_9, window_bounds = array<i64: 64, 32>}]} {
    %c0 = arith.constant 0 : index
    %c0_0 = arith.constant 0 : index
    %0 = vector.load %arg1[%c0, %c0_0] : memref<64x64xf32, #tpu.memory_space<vmem>>, vector<64x64xf32>
    %cst = arith.constant dense<0.000000e+00> : vector<64xf32>
    %1 = vector.multi_reduction <add>, %0, %cst [1] : vector<64x64xf32> to vector<64xf32>
    %2 = vector.shape_cast %1 : vector<64xf32> to vector<64x1xf32>
    %cst_1 = arith.constant 6.400000e+01 : f32
    %3 = vector.broadcast %cst_1 : f32 to vector<64x1xf32>
    %4 = arith.divf %2, %3 : vector<64x1xf32>
    %5 = vector.broadcast %4 : vector<64x1xf32> to vector<64x64xf32>
    %6 = arith.subf %0, %5 : vector<64x64xf32>
    %7 = arith.mulf %6, %6 : vector<64x64xf32>
    %cst_2 = arith.constant dense<0.000000e+00> : vector<64xf32>
    %8 = vector.multi_reduction <add>, %7, %cst_2 [1] : vector<64x64xf32> to vector<64xf32>
    %9 = vector.shape_cast %8 : vector<64xf32> to vector<64x1xf32>
    %cst_3 = arith.constant 6.400000e+01 : f32
    %10 = vector.broadcast %cst_3 : f32 to vector<64x1xf32>
    %11 = arith.divf %9, %10 : vector<64x1xf32>
    %12 = vector.broadcast %4 : vector<64x1xf32> to vector<64x64xf32>
    %13 = arith.subf %0, %12 : vector<64x64xf32>
    %cst_4 = arith.constant 9.99999974E-6 : f32
    %14 = vector.broadcast %cst_4 : f32 to vector<64x1xf32>
    %15 = arith.addf %11, %14 : vector<64x1xf32>
    %16 = math.rsqrt %15 : vector<64x1xf32>
    %17 = vector.broadcast %16 : vector<64x1xf32> to vector<64x64xf32>
    %18 = arith.mulf %13, %17 : vector<64x64xf32>
    %c0_5 = arith.constant 0 : index
    %c0_6 = arith.constant 0 : index
    %19 = vector.load %arg3[%c0_5, %c0_6] : memref<1x64xf32, #tpu.memory_space<vmem>>, vector<1x64xf32>
    %20 = vector.broadcast %19 : vector<1x64xf32> to vector<64x64xf32>
    %21 = arith.mulf %18, %20 : vector<64x64xf32>
    %c0_7 = arith.constant 0 : index
    %c0_8 = arith.constant 0 : index
    %22 = vector.load %arg4[%c0_7, %c0_8] : memref<1x64xf32, #tpu.memory_space<vmem>>, vector<1x64xf32>
    %23 = vector.broadcast %22 : vector<1x64xf32> to vector<64x64xf32>
    %24 = arith.addf %21, %23 : vector<64x64xf32>
    %25 = arith.truncf %24 : vector<64x64xf32> to vector<64x64xbf16>
    %c0_9 = arith.constant 0 : index
    %c0_10 = arith.constant 0 : index
    %26 = vector.load %arg2[%c0_9, %c0_10] : memref<64x1xf32, #tpu.memory_space<vmem>>, vector<64x1xf32>
    %c0_11 = arith.constant 0 : index
    %c0_12 = arith.constant 0 : index
    %27 = vector.load %arg5[%c0_11, %c0_12] : memref<64x32xbf16, #tpu.memory_space<vmem>>, vector<64x32xbf16>
    %cst_13 = arith.constant dense<0.000000e+00> : vector<64x32xf32>
    %28 = tpu.matmul %25, %27, %cst_13 {dimension_numbers = #tpu.dot_dimension_numbers<[1], [0], [0], [1], [0, 0, 1, 1], [], []>} : vector<64x64xbf16>, vector<64x32xbf16>, vector<64x32xf32> -> vector<64x32xf32>
    %c0_14 = arith.constant 0 : index
    %c0_15 = arith.constant 0 : index
    %29 = vector.load %arg6[%c0_14, %c0_15] : memref<1x32xf32, #tpu.memory_space<vmem>>, vector<1x32xf32>
    %30 = vector.broadcast %29 : vector<1x32xf32> to vector<64x32xf32>
    %31 = arith.addf %28, %30 : vector<64x32xf32>
    %32 = vector.broadcast %26 : vector<64x1xf32> to vector<64x32xf32>
    %33 = arith.mulf %31, %32 : vector<64x32xf32>
    %c0_16 = arith.constant 0 : index
    %c0_17 = arith.constant 0 : index
    %34 = vector.load %arg7[%c0_16, %c0_17] : memref<64x32xbf16, #tpu.memory_space<vmem>>, vector<64x32xbf16>
    %cst_18 = arith.constant dense<0.000000e+00> : vector<64x32xf32>
    %35 = tpu.matmul %25, %34, %cst_18 {dimension_numbers = #tpu.dot_dimension_numbers<[1], [0], [0], [1], [0, 0, 1, 1], [], []>} : vector<64x64xbf16>, vector<64x32xbf16>, vector<64x32xf32> -> vector<64x32xf32>
    %c0_19 = arith.constant 0 : index
    %c0_20 = arith.constant 0 : index
    %36 = vector.load %arg8[%c0_19, %c0_20] : memref<1x32xf32, #tpu.memory_space<vmem>>, vector<1x32xf32>
    %37 = vector.broadcast %36 : vector<1x32xf32> to vector<64x32xf32>
    %38 = arith.addf %35, %37 : vector<64x32xf32>
    %39 = vector.broadcast %26 : vector<64x1xf32> to vector<64x32xf32>
    %40 = arith.mulf %38, %39 : vector<64x32xf32>
    %41 = arith.truncf %33 : vector<64x32xf32> to vector<64x32xbf16>
    %c0_21 = arith.constant 0 : index
    %c0_22 = arith.constant 0 : index
    %42 = vector.load %arg9[%c0_21, %c0_22] : memref<64x32xbf16, #tpu.memory_space<vmem>>, vector<64x32xbf16>
    tpu.vector_store %arg9[%c0_21, %c0_22], %41 {strides = array<i32>} : memref<64x32xbf16, #tpu.memory_space<vmem>>, vector<64x32xbf16>,
    %c0_23 = arith.constant 0 : index
    %c0_24 = arith.constant 0 : index
    %43 = vector.load %arg10[%c0_23, %c0_24] : memref<64x32xf32, #tpu.memory_space<vmem>>, vector<64x32xf32>
    tpu.vector_store %arg10[%c0_23, %c0_24], %40 {strides = array<i32>} : memref<64x32xf32, #tpu.memory_space<vmem>>, vector<64x32xf32>,
    return
  }
  func.func @transform_0(%arg0: i32) -> (i32, i32) {
    %c0_i32 = arith.constant 0 : i32
    %c0_i32_0 = arith.constant 0 : i32
    return %arg0, %c0_i32 : i32, i32
  }
  func.func @transform_1(%arg0: i32) -> (i32, i32) {
    %c0_i32 = arith.constant 0 : i32
    %c0_i32_0 = arith.constant 0 : i32
    return %arg0, %c0_i32 : i32, i32
  }
  func.func @transform_2(%arg0: i32) -> (i32, i32) {
    %c0_i32 = arith.constant 0 : i32
    %c0_i32_0 = arith.constant 0 : i32
    %c0_i32_1 = arith.constant 0 : i32
    return %c0_i32, %c0_i32_0 : i32, i32
  }
  func.func @transform_3(%arg0: i32) -> (i32, i32) {
    %c0_i32 = arith.constant 0 : i32
    %c0_i32_0 = arith.constant 0 : i32
    %c0_i32_1 = arith.constant 0 : i32
    return %c0_i32, %c0_i32_0 : i32, i32
  }
  func.func @transform_4(%arg0: i32) -> (i32, i32) {
    %c0_i32 = arith.constant 0 : i32
    %c0_i32_0 = arith.constant 0 : i32
    %c0_i32_1 = arith.constant 0 : i32
    return %c0_i32, %c0_i32_0 : i32, i32
  }
  func.func @transform_5(%arg0: i32) -> (i32, i32) {
    %c0_i32 = arith.constant 0 : i32
    %c0_i32_0 = arith.constant 0 : i32
    %c0_i32_1 = arith.constant 0 : i32
    return %c0_i32, %c0_i32_0 : i32, i32
  }
  func.func @transform_6(%arg0: i32) -> (i32, i32) {
    %c0_i32 = arith.constant 0 : i32
    %c0_i32_0 = arith.constant 0 : i32
    %c0_i32_1 = arith.constant 0 : i32
    return %c0_i32, %c0_i32_0 : i32, i32
  }
  func.func @transform_7(%arg0: i32) -> (i32, i32) {
    %c0_i32 = arith.constant 0 : i32
    %c0_i32_0 = arith.constant 0 : i32
    %c0_i32_1 = arith.constant 0 : i32
    return %c0_i32, %c0_i32_0 : i32, i32
  }
  func.func @transform_8(%arg0: i32) -> (i32, i32) {
    %c0_i32 = arith.constant 0 : i32
    %c0_i32_0 = arith.constant 0 : i32
    return %arg0, %c0_i32 : i32, i32
  }
  func.func @transform_9(%arg0: i32) -> (i32, i32) {
    %c0_i32 = arith.constant 0 : i32
    %c0_i32_0 = arith.constant 0 : i32
    return %arg0, %c0_i32 : i32, i32
  }
}

</mosaic_0001>

<bundles_post_ra>
// kernel: tpu_custom_call.1
= control target key start
LH: loop header
LB: loop body
LE: loop exit
PB: predicated region body
PF: predicated region fallthrough
CT: control target
= control target key end

     0   :  { %vm40_vm0 = vcmask 523264   ;;  %vm496_vm1 = vcmask 257024   ;;  %vm505_vm2 = vcmask 261120   ;;  %s924_s0 = inlined_call_operand.vmem [shape: f32[64,64], index: 0, kind: input, shape index: {}]   ;;  %s925_s4 = inlined_call_operand.vmem [shape: bf16[64,32], index: 4, kind: input, shape index: {}]   ;;  %s926_s6 = inlined_call_operand.vmem [shape: bf16[64,32], index: 6, kind: input, shape index: {}]   ;;  %s927_s1 = inlined_call_operand.vmem [shape: f32[64,1], index: 1, kind: input, shape index: {}]   ;;  %s928_s2 = inlined_call_operand.vmem [shape: f32[1,64], index: 2, kind: input, shape index: {}]   ;;  %s929_s3 = inlined_call_operand.vmem [shape: f32[1,64], index: 3, kind: input, shape index: {}]   ;;  %s930_s5 = inlined_call_operand.vmem [shape: f32[1,32], index: 5, kind: input, shape index: {}]   ;;  %s931_s7 = inlined_call_operand.vmem [shape: f32[1,32], index: 7, kind: input, shape index: {}]   ;;  %s932_s9 = inlined_call_operand.vmem [shape: f32[64,32], index: 9, kind: output, shape index: {1}]   ;;  %s933_s8 = inlined_call_operand.vmem [shape: bf16[64,32], index: 8, kind: output, shape index: {0}]  }
   0x1   :  { %v32_v0 = vld [vmem:[%s924_s0] sm:$0xff]  ;;  %v34_v1 = vld [vmem:[%s924_s0 + $0x10] sm:$0xff]  ;;  %v33_v2 = vld [vmem:[%s924_s0 + $0x8] sm:$0xff] }
   0x2   :  { %v41_v3 = vsel %vm40_vm0, %v32_v0, 0.0  ;;  %v47_v4 = vsel %vm40_vm0, %v34_v1, 0.0  ;;  %v35_v5 = vld [vmem:[%s924_s0 + $0x18] sm:$0xff]  ;;  %v44_v6 = vsel %vm40_vm0, %v33_v2, 0.0  ;;  %v36_v8 = vld [vmem:[%s924_s0 + $0x20] sm:$0xff]  ;;  %v37_v9 = vld [vmem:[%s924_s0 + $0x28] sm:$0xff] }
   0x3   :  { %42 = vadd.xlane.f32.xlu0 %v41_v3  ;;  %48 = vadd.xlane.f32.xlu1 %v47_v4  ;;  %v50_v7 = vsel %vm40_vm0, %v35_v5, 0.0  ;;  %v53_v10 = vsel %vm40_vm0, %v36_v8, 0.0  ;;  %v56_v11 = vsel %vm40_vm0, %v37_v9, 0.0  ;;  %v38_v12 = vld [vmem:[%s924_s0 + $0x30] sm:$0xff]  ;;  %v39_v13 = vld [vmem:[%s924_s0 + $0x38] sm:$0xff]  ;;  %v609_v56 = vld [vmem:[%s925_s4] sm:$0xff]  }
   0x4   :  { %v59_v14 = vsel %vm40_vm0, %v38_v12, 0.0  ;;  %v62_v15 = vsel %vm40_vm0, %v39_v13, 0.0  ;;  %v610_v57 = vld [vmem:[%s926_s6] sm:$0xff]   ;;  %574 = vmatprep.subr.bf16.mxu0 %v609_v56  ;;  %v611_v58 = vld [vmem:[%s925_s4 + $0x8] sm:$0xff]   ;;  %v613_v60 = vld [vmem:[%s925_s4 + $0x10] sm:$0xff]  }
   0x5   :  { %590 = vmatprep.subr.bf16.mxu1 %v610_v57  ;;  %575 = vmatpush3.bf16.msra.mxu0 %v609_v56  ;;  %v612_v59 = vld [vmem:[%s926_s6 + $0x8] sm:$0xff]   ;;  %v614_v61 = vld [vmem:[%s926_s6 + $0x10] sm:$0xff]   ;;  %v615_v62 = vld [vmem:[%s925_s4 + $0x18] sm:$0xff]  }
   0x6   :  { %591 = vmatpush3.bf16.msra.mxu1 %v610_v57  ;;  %576 = vmatprep.subr.bf16.mxu0 %v611_v58  ;;  %v616_v63 = vld [vmem:[%s926_s6 + $0x18] sm:$0xff]   ;;  %v180_v3 = vld [vmem:[%s927_s1] sm:$0xff] }
   0x7   :  { %45 = vadd.xlane.f32.xlu0 %v44_v6  ;;  %51 = vadd.xlane.f32.xlu1 %v50_v7  ;;  %v183_v4 = vld [vmem:[%s927_s1 + $0x18] sm:$0xff]  ;;  %v185_v6 = vld [vmem:[%s927_s1 + $0x28] sm:$0xff]  ;;  %v186_v7 = vld [vmem:[%s927_s1 + $0x30] sm:$0xff] }
   0x8   :  { %592 = vmatprep.subr.bf16.mxu1 %v612_v59 }
   0x9   :  { %577 = vmatpush3.bf16.msra.mxu0 %v611_v58 }
   0xa   :  { %593 = vmatpush3.bf16.msra.mxu1 %v612_v59  ;;  %578 = vmatprep.subr.bf16.mxu0 %v613_v60 }
   0xb   :  { %54 = vadd.xlane.f32.xlu0 %v53_v10  ;;  %57 = vadd.xlane.f32.xlu1 %v56_v11 }
   0xc   :  { %594 = vmatprep.subr.bf16.mxu1 %v614_v61 }
   0xd   :  { %579 = vmatpush3.bf16.msra.mxu0 %v613_v60 }
   0xe   :  { %595 = vmatpush3.bf16.msra.mxu1 %v614_v61  ;;  %580 = vmatprep.subr.bf16.mxu0 %v615_v62 }
   0xf   :  { %60 = vadd.xlane.f32.xlu0 %v59_v14  ;;  %63 = vadd.xlane.f32.xlu1 %v62_v15 }
  0x10   :  { %596 = vmatprep.subr.bf16.mxu1 %v616_v63 }
  0x11   :  { %581 = vmatpush3.bf16.msra.mxu0 %v615_v62 }
  0x12   :  { %597 = vmatpush3.bf16.msra.mxu1 %v616_v63 }
  0x90   :  { %v43_v16 = vpop.xlane.xlu0 %42  ;;  %v49_v17 = vpop.xlane.xlu1 %48 }
  0x91   :  { %v66_v18 = vmul.f32 0.015625, %v43_v16  ;;  %v68_v19 = vmul.f32 0.015625, %v49_v17 }
  0x93   :  { %v716_v20 = vsub.f32 %v32_v0, %v66_v18  ;;  %v718_v21 = vsub.f32 %v34_v1, %v68_v19  ;;  %v633_v0 = vmov 0   ;;  %v181_v1 = vld [vmem:[%s927_s1 + $0x8] sm:$0xff] }
  0x94   :  { %v46_v22 = vpop.xlane.xlu0 %45  ;;  %v52_v23 = vpop.xlane.xlu1 %51  ;;  %608 = vset.pattern.permute.xlu1 %v633_v0  ;;  %607 = vset.pattern.permute.xlu0 %v633_v0 }
  0x95   :  { %v67_v24 = vmul.f32 0.015625, %v46_v22  ;;  %v69_v25 = vmul.f32 0.015625, %v52_v23  ;;  %v82_v26 = vmul.f32 %v716_v20, %v716_v20  ;;  %v84_v27 = vmul.f32 %v718_v21, %v718_v21 }
  0x97   :  { %v724_v28 = vsub.f32 %v33_v2, %v67_v24  ;;  %v726_v29 = vsub.f32 %v35_v5, %v69_v25  ;;  %v90_v30 = vsel %vm40_vm0, %v82_v26, 0.0  ;;  %v96_v33 = vsel %vm40_vm0, %v84_v27, 0.0  ;;  %v182_v2 = vld [vmem:[%s927_s1 + $0x10] sm:$0xff]  ;;  %v184_v5 = vld [vmem:[%s927_s1 + $0x20] sm:$0xff] }
  0x98   :  { %91 = vadd.xlane.f32.xlu0 %v90_v30  ;;  %v55_v31 = vpop.xlane.xlu0 %54  ;;  %v58_v32 = vpop.xlane.xlu1 %57 }
  0x99   :  { %v70_v34 = vmul.f32 0.015625, %v55_v31  ;;  %v71_v35 = vmul.f32 0.015625, %v58_v32  ;;  %v83_v36 = vmul.f32 %v724_v28, %v724_v28  ;;  %v85_v37 = vmul.f32 %v726_v29, %v726_v29 }
  0x9b   :  { %v734_v38 = vsub.f32 %v36_v8, %v70_v34  ;;  %v736_v39 = vsub.f32 %v37_v9, %v71_v35  ;;  %v93_v40 = vsel %vm40_vm0, %v83_v36, 0.0  ;;  %v99_v43 = vsel %vm40_vm0, %v85_v37, 0.0  ;;  %v187_v8 = vld [vmem:[%s927_s1 + $0x38] sm:$0xff] }
  0x9c   :  { %97 = vadd.xlane.f32.xlu0 %v96_v33  ;;  %94 = vadd.xlane.f32.xlu1 %v93_v40  ;;  %v61_v41 = vpop.xlane.xlu0 %60  ;;  %v64_v42 = vpop.xlane.xlu1 %63  ;;  %v522_v40 = vld [vmem:[%s928_s2] ss:$0 sm:$0xff] }
  0x9d   :  { %v72_v44 = vmul.f32 0.015625, %v61_v41  ;;  %v73_v45 = vmul.f32 0.015625, %v64_v42  ;;  %v86_v46 = vmul.f32 %v734_v38, %v734_v38  ;;  %v87_v47 = vmul.f32 %v736_v39, %v736_v39 }
  0x9f   :  { %v744_v48 = vsub.f32 %v38_v12, %v72_v44  ;;  %v746_v49 = vsub.f32 %v39_v13, %v73_v45  ;;  %v102_v50 = vsel %vm40_vm0, %v86_v46, 0.0  ;;  %v105_v51 = vsel %vm40_vm0, %v87_v47, 0.0 }
  0xa0   :  { %100 = vadd.xlane.f32.xlu1 %v99_v43  ;;  %103 = vadd.xlane.f32.xlu0 %v102_v50 }
  0xa1   :  { %v88_v52 = vmul.f32 %v744_v48, %v744_v48  ;;  %v89_v53 = vmul.f32 %v746_v49, %v746_v49 }
  0xa3   :  { %v108_v54 = vsel %vm40_vm0, %v88_v52, 0.0  ;;  %v111_v55 = vsel %vm40_vm0, %v89_v53, 0.0 }
  0xa4   :  { %106 = vadd.xlane.f32.xlu1 %v105_v51  ;;  %109 = vadd.xlane.f32.xlu0 %v108_v54 }
  0xa8   :  { %112 = vadd.xlane.f32.xlu1 %v111_v55 }
  0xb9   :  { %311 = vperm.xlu1 %608, %v181_v1  }
  0xba   :  { %306 = vperm.xlu0 %607, %v180_v3  }
  0xbd   :  { %316 = vperm.xlu1 %608, %v182_v2  }
  0xc1   :  { %321 = vperm.xlu1 %608, %v183_v4  }
  0xc5   :  { %326 = vperm.xlu1 %608, %v184_v5  }
  0xc9   :  { %331 = vperm.xlu1 %608, %v185_v6  }
  0xcd   :  { %336 = vperm.xlu1 %608, %v186_v7  }
  0xd1   :  { %341 = vperm.xlu1 %608, %v187_v8  }
 0x125   :  { %v92_v9 = vpop.xlane.xlu0 %91 }
 0x126   :  { %v114_v10 = vmul.f32 0.015625, %v92_v9 }
 0x128   :  { %v122_v11 = vadd.f32 1e-05, %v114_v10 }
 0x129   :  { %v95_v12 = vpop.xlane.xlu1 %94  ;;  %v98_v13 = vpop.xlane.xlu0 %97 }
 0x12a   :  { %617 = vrsqrt.f32 %v122_v11  ;;  %v115_v14 = vmul.f32 0.015625, %v95_v12  ;;  %v116_v15 = vmul.f32 0.015625, %v98_v13  ;;  %v831_v11 = vld [vmem:[%s930_s5] ss:$0 sm:$0xff] }
 0x12b   :  { %v836_v12 = vld [vmem:[%s931_s7] ss:$0 sm:$0xff] }
 0x12c   :  { %v123_v16 = vadd.f32 1e-05, %v115_v14  ;;  %v124_v17 = vadd.f32 1e-05, %v116_v15 }
 0x12d   :  { %v101_v18 = vpop.xlane.xlu1 %100  ;;  %v104_v19 = vpop.xlane.xlu0 %103 }
 0x12e   :  { %619 = vrsqrt.f32 %v123_v16  ;;  %v117_v22 = vmul.f32 0.015625, %v101_v18  ;;  %v118_v23 = vmul.f32 0.015625, %v104_v19 }
 0x12f   :  { %621 = vrsqrt.f32 %v124_v17 }
 0x130   :  { %v125_v24 = vadd.f32 1e-05, %v117_v22  ;;  %v126_v25 = vadd.f32 1e-05, %v118_v23 }
 0x131   :  { %v107_v26 = vpop.xlane.xlu1 %106  ;;  %v110_v27 = vpop.xlane.xlu0 %109 }
 0x132   :  { %623 = vrsqrt.f32 %v125_v24  ;;  %v119_v30 = vmul.f32 0.015625, %v107_v26  ;;  %v120_v31 = vmul.f32 0.015625, %v110_v27 }
 0x133   :  { %625 = vrsqrt.f32 %v126_v25 }
 0x134   :  { %v618_v32 = vpop.eup %617  ;;  %v127_v33 = vadd.f32 1e-05, %v119_v30  ;;  %v128_v34 = vadd.f32 1e-05, %v120_v31 }
 0x135   :  { %v113_v35 = vpop.xlane.xlu1 %112  ;;  %v138_v36 = vmul.f32 %v618_v32, %v716_v20  ;;  %v523_v20 = vld [vmem:[%s929_s3] ss:$0 sm:$0xff] }
 0x136   :  { %627 = vrsqrt.f32 %v127_v33  ;;  %v121_v37 = vmul.f32 0.015625, %v113_v35 }
 0x137   :  { %629 = vrsqrt.f32 %v128_v34  ;;  %v153_v45 = vmul.f32 %v522_v40, %v138_v36 }
 0x138   :  { %v620_v41 = vpop.eup %619  ;;  %v129_v42 = vadd.f32 1e-05, %v121_v37 }
 0x139   :  { %v622_v43 = vpop.eup %621  ;;  %v139_v44 = vmul.f32 %v620_v41, %v724_v28  ;;  %v168_v53 = vadd.f32 %v523_v20, %v153_v45  ;;  %v307_v14 = vpop.permute.xlu0 %306 }
 0x13a   :  { %v140_v46 = vmul.f32 %v622_v43, %v718_v21  ;;  %631 = vrsqrt.f32 %v129_v42 }
 0x13b   :  { %v154_v47 = vmul.f32 %v522_v40, %v139_v44 }
 0x13c   :  { %v624_v50 = vpop.eup %623  ;;  %v155_v55 = vmul.f32 %v522_v40, %v140_v46 }
 0x13d   :  { %v626_v51 = vpop.eup %625  ;;  %v141_v52 = vmul.f32 %v624_v50, %v726_v29  ;;  %v169_v54 = vadd.f32 %v523_v20, %v154_v47 }
 0x13e   :  { %v142_v56 = vmul.f32 %v626_v51, %v734_v38  ;;  %v170_v61 = vadd.f32 %v523_v20, %v155_v55 }
 0x13f   :  { %v176_v57 = vpack.c.bf16 %v169_v54, %v168_v53  ;;  %v156_v28 = vmul.f32 %v522_v40, %v141_v52 }
 0x140   :  { %v628_v58 = vpop.eup %627  ;;  %v157_v59 = vmul.f32 %v522_v40, %v142_v56 }
 0x141   :  { %v630_v21 = vpop.eup %629  ;;  %v143_v60 = vmul.f32 %v628_v58, %v736_v39  ;;  %582 = vmatprep.mubr.msk.bf16.mxu0 %vm40_vm0, %v176_v57  ;;  %598 = vmatprep.mubr.msk.bf16.mxu1 %vm40_vm0, %v176_v57  ;;  %v171_v62 = vadd.f32 %v523_v20, %v156_v28 }
 0x142   :  { %v144_v29 = vmul.f32 %v630_v21, %v744_v48  ;;  %v172_v2 = vadd.f32 %v523_v20, %v157_v59 }
 0x143   :  { %v177_v63 = vpack.c.bf16 %v171_v62, %v170_v61  ;;  %v158_v0 = vmul.f32 %v522_v40, %v143_v60 }
 0x144   :  { %v632_v1 = vpop.eup %631  ;;  %v159_v39 = vmul.f32 %v522_v40, %v144_v29 }
 0x145   :  { %v145_v38 = vmul.f32 %v632_v1, %v746_v49  ;;  %583 = vmatmul.mubr.msk.bf16.vlgmr.msra.gmra.mrb[0].mxu0 %vm40_vm0, %v177_v63  ;;  %599 = vmatmul.mubr.msk.bf16.vlgmr.msra.gmra.mrb[0].mxu1 %vm40_vm0, %v177_v63  ;;  %v173_v3 = vadd.f32 %v523_v20, %v158_v0  ;;  %v312_v49 = vpop.permute.xlu1 %311 }
 0x146   :  { %v174_v6 = vadd.f32 %v523_v20, %v159_v39 }
 0x147   :  { %v178_v4 = vpack.c.bf16 %v173_v3, %v172_v2  ;;  %v160_v5 = vmul.f32 %v522_v40, %v145_v38 }
 0x149   :  { %586 = vmatprep.mubr.msk.bf16.mxu0 %vm40_vm0, %v178_v4  ;;  %602 = vmatprep.mubr.msk.bf16.mxu1 %vm40_vm0, %v178_v4  ;;  %v175_v48 = vadd.f32 %v523_v20, %v160_v5  ;;  %v317_v8 = vpop.permute.xlu1 %316 }
 0x14b   :  { %v179_v7 = vpack.c.bf16 %v175_v48, %v174_v6 }
 0x14d   :  { %587 = vmatmul.mubr.msk.bf16.gmra.mrb[4].mxu0 %vm40_vm0, %v179_v7  ;;  %603 = vmatmul.mubr.msk.bf16.gmra.mrb[4].mxu1 %vm40_vm0, %v179_v7  ;;  %v322_v9 = vpop.permute.xlu1 %321 }
 0x151   :  { %v826_v10 = vpop.permute.xlu1 %326 }
 0x155   :  { %v838_v13 = vpop.permute.xlu1 %331 }
 0x159   :  { %v337_v44 = vpop.permute.xlu1 %336 }
 0x15d   :  { %v342_v0 = vpop.permute.xlu1 %341 }
 0x218   :  { %v584_v15 = vpop.f32.mrb[0].mxu0  ;;  %v600_v16 = vpop.f32.mrb[0].mxu1 }
 0x219   :  { %v282_v17 = vadd.f32 %v584_v15, %v831_v11  ;;  %v434_v18 = vadd.f32 %v600_v16, %v836_v12  ;;  %v273_v19 = vpop.f32.mrb[1].mxu0  ;;  %v425_v22 = vpop.f32.mrb[1].mxu1 }
 0x21a   :  { %v274_v23 = vadd.f32 %v831_v11, %v273_v19  ;;  %v426_v24 = vadd.f32 %v836_v12, %v425_v22  ;;  %v585_v25 = vpop.f32.mrb[2].mxu0  ;;  %v601_v26 = vpop.f32.mrb[2].mxu1 }
 0x21b   :  { %v346_v27 = vmul.f32 %v317_v8, %v282_v17  ;;  %v458_v30 = vmul.f32 %v434_v18, %v317_v8  ;;  %v285_v31 = vadd.f32 %v585_v25, %v831_v11  ;;  %v437_v32 = vadd.f32 %v601_v26, %v836_v12  ;;  %v276_v33 = vpop.f32.mrb[3].mxu0  ;;  %v428_v34 = vpop.f32.mrb[3].mxu1 }
 0x21c   :  { %v277_v35 = vadd.f32 %v831_v11, %v276_v33  ;;  %v429_v36 = vadd.f32 %v836_v12, %v428_v34  ;;  %v344_v37 = vmul.f32 %v307_v14, %v274_v23  ;;  %v456_v40 = vmul.f32 %v426_v24, %v307_v14 }
 0x21d   :  { %v552_v41 = vpack.c.bf16 %v346_v27, %v346_v27  ;;  %508 = vst.msk [vmem:[%s932_s9 + $0x10] sm:$0xff] %vm505_vm2, %v458_v30  ;;  %v347_v42 = vmul.f32 %v322_v9, %v285_v31  ;;  %v459_v43 = vmul.f32 %v437_v32, %v322_v9 }
 0x21e   :  { %v345_v45 = vmul.f32 %v312_v49, %v277_v35  ;;  %v457_v46 = vmul.f32 %v429_v36, %v312_v49  ;;  %v550_v20 = vpack.c.bf16 %v344_v37, %v344_v37  ;;  %506 = vst.msk [vmem:[%s932_s9] sm:$0xff] %vm505_vm2, %v456_v40 }
 0x21f   :  { %499 = vst.msk [vmem:[%s933_s8 + $0x8] sm:$0xf] %vm496_vm1, %v552_v41  ;;  %v553_v47 = vpack.c.bf16 %v347_v42, %v347_v42 }
 0x220   :  { %509 = vst.msk [vmem:[%s932_s9 + $0x18] sm:$0xff] %vm505_vm2, %v459_v43  ;;  %v551_v50 = vpack.c.bf16 %v345_v45, %v345_v45  ;;  %507 = vst.msk [vmem:[%s932_s9 + $0x8] sm:$0xff] %vm505_vm2, %v457_v46  ;;  %v588_v51 = vpop.f32.mrb[4].mxu0  ;;  %v604_v52 = vpop.f32.mrb[4].mxu1 }
 0x221   :  { %497 = vst.msk [vmem:[%s933_s8] sm:$0xf] %vm496_vm1, %v550_v20  ;;  %500 = vst.msk [vmem:[%s933_s8 + $0xc] sm:$0xf] %vm496_vm1, %v553_v47  ;;  %v298_v53 = vadd.f32 %v588_v51, %v831_v11  ;;  %v450_v54 = vadd.f32 %v604_v52, %v836_v12  ;;  %v289_v55 = vpop.f32.mrb[5].mxu0  ;;  %v441_v56 = vpop.f32.mrb[5].mxu1 }
 0x222   :  { %498 = vst.msk [vmem:[%s933_s8 + $0x4] sm:$0xf] %vm496_vm1, %v551_v50  ;;  %v290_v57 = vadd.f32 %v831_v11, %v289_v55  ;;  %v442_v28 = vadd.f32 %v836_v12, %v441_v56  ;;  %v589_v58 = vpop.f32.mrb[6].mxu0  ;;  %v605_v59 = vpop.f32.mrb[6].mxu1 }
 0x223   :  { %v350_v21 = vmul.f32 %v337_v44, %v298_v53  ;;  %v462_v60 = vmul.f32 %v450_v54, %v337_v44  ;;  %v301_v61 = vadd.f32 %v589_v58, %v831_v11  ;;  %v453_v62 = vadd.f32 %v605_v59, %v836_v12  ;;  %v292_v29 = vpop.f32.mrb[7].mxu0  ;;  %v444_v63 = vpop.f32.mrb[7].mxu1 }
 0x224   :  { %v348_v1 = vmul.f32 %v826_v10, %v290_v57  ;;  %v460_v2 = vmul.f32 %v442_v28, %v826_v10  ;;  %v293_v38 = vadd.f32 %v831_v11, %v292_v29  ;;  %v445_v3 = vadd.f32 %v836_v12, %v444_v63 }
 0x225   :  { %v556_v39 = vpack.c.bf16 %v350_v21, %v350_v21  ;;  %512 = vst.msk [vmem:[%s932_s9 + $0x30] sm:$0xff] %vm505_vm2, %v462_v60  ;;  %v351_v4 = vmul.f32 %v342_v0, %v301_v61  ;;  %v463_v5 = vmul.f32 %v453_v62, %v342_v0 }
 0x226   :  { %v554_v6 = vpack.c.bf16 %v348_v1, %v348_v1  ;;  %510 = vst.msk [vmem:[%s932_s9 + $0x20] sm:$0xff] %vm505_vm2, %v460_v2  ;;  %v349_v48 = vmul.f32 %v838_v13, %v293_v38  ;;  %v461_v7 = vmul.f32 %v445_v3, %v838_v13 }
 0x227   :  { %503 = vst.msk [vmem:[%s933_s8 + $0x18] sm:$0xf] %vm496_vm1, %v556_v39  ;;  %v557_v49 = vpack.c.bf16 %v351_v4, %v351_v4 }
 0x228   :  { %513 = vst.msk [vmem:[%s932_s9 + $0x38] sm:$0xff] %vm505_vm2, %v463_v5  ;;  %v555_v8 = vpack.c.bf16 %v349_v48, %v349_v48  ;;  %511 = vst.msk [vmem:[%s932_s9 + $0x28] sm:$0xff] %vm505_vm2, %v461_v7 }
 0x229   :  { %501 = vst.msk [vmem:[%s933_s8 + $0x10] sm:$0xf] %vm496_vm1, %v554_v6  ;;  %504 = vst.msk [vmem:[%s933_s8 + $0x1c] sm:$0xf] %vm496_vm1, %v557_v49 }
 0x22a   :  { %502 = vst.msk [vmem:[%s933_s8 + $0x14] sm:$0xf] %vm496_vm1, %v555_v8 }

</bundles_post_ra>
